<compile_context>
chip_gen: v5e
topology: v5e:2x2
jax: 0.10.0
libtpu: 0.0.40
codegen_flags: <defaults>
</compile_context>

<pallas_src>
import math
import functools
import warnings

import jax
import jax.numpy as jnp
from jax import lax
from jax.experimental import pallas as pl
from jax.experimental.pallas import tpu as pltpu


# --------------------------------------------------------------------------- #
# Kernel
# --------------------------------------------------------------------------- #
def _flash_sdpa_kernel(q_ref, k_ref, v_ref, o_ref,
                       m_ref, l_ref, acc_ref, qs_ref,
                       *, scale, exp_dtype, approx_recip):
    """One grid step: (hb, tL, D) queries vs one (hb, tS, D) K/V tile.

    Grid axes: (head-block, L-block, S-block).  The S axis is innermost and
    'arbitrary'; m/l/acc scratch carries the online-softmax state across it.
    """
    kv = pl.program_id(2)

    @pl.when(kv == 0)
    def _init():
        m_ref[...] = jnp.full(m_ref.shape, -jnp.inf, dtype=m_ref.dtype)
        l_ref[...] = jnp.zeros(l_ref.shape, dtype=l_ref.dtype)
        acc_ref[...] = jnp.zeros(acc_ref.shape, dtype=acc_ref.dtype)
        # Hoist Q * scale out of the kv loop: the Q block is resident across
        # the whole (innermost) S axis, so scale it exactly once per L-block.
        # (Folding the scale into Q in the input dtype is O(L*D) work instead
        # of O(L*S); tiny precision loss vs scaling f32 scores, within dtype
        # noise for typical head dims.)
        qs_ref[...] = q_ref[...] * jnp.asarray(scale, dtype=q_ref.dtype)

    # scores = (scale*Q) @ K^T, contracting on head_dim without transposing K;
    # matmul inputs stay in their native dtype (bf16 fast MXU path), f32 acc.
    s = lax.dot_general(
        qs_ref[...], k_ref[...],
        dimension_numbers=(((2,), (2,)), ((0,), (0,))),
        preferred_element_type=jnp.float32)                     # (hb, tL, tS)

    # Online (flash) softmax update.  alpha is computed narrow ((hb,tL,1)) so
    # the EUP only does tL extra exps per step, not tL*128.
    m_prev = m_ref[...]                                         # (hb, tL, 1)
    m_new = jnp.maximum(m_prev, jnp.max(s, axis=-1, keepdims=True))
    alpha = jnp.exp(m_prev - m_new)                             # (hb, tL, 1)

    # Probabilities: exp in `exp_dtype` (bf16 on chips with a bf16 EUP); the
    # row-sum is always accumulated in f32, and p feeds the PV matmul in V's
    # dtype (a no-op cast on the bf16 path).
    p = jnp.exp((s - m_new).astype(exp_dtype))                  # (hb, tL, tS)

    l_ref[...] = alpha * l_ref[...] + jnp.sum(
        p.astype(jnp.float32), axis=-1, keepdims=True)

    pv = lax.dot_general(
        p.astype(v_ref.dtype), v_ref[...],
        dimension_numbers=(((2,), (1,)), ((0,), (0,))),
        preferred_element_type=jnp.float32)                     # (hb, tL, D)
    acc_ref[...] = alpha * acc_ref[...] + pv
    m_ref[...] = m_new

    @pl.when(kv == pl.num_programs(2) - 1)
    def _finalize():
        # Deferred 1/denominator applied on the (L, D) output, not the (L, S)
        # matrix; EUP approx reciprocal on the low-precision path, exact divide
        # for f32 outputs.
        inv = pl.reciprocal(l_ref[...], approx=approx_recip)
        o_ref[...] = (acc_ref[...] * inv).astype(o_ref.dtype)


# --------------------------------------------------------------------------- #
# Tiling helpers
# --------------------------------------------------------------------------- #
def _pick_seq_tile(n, target, itemsize):
    """Largest tile <= target that divides n, preferring MXU-friendly multiples
    of 256, then 128, then the dtype's sublane packing multiple (8 for 4-byte,
    16 for 2-byte, 32 for 1-byte), else the full extent."""
    if n <= target:
        return n
    pack = max(8, 32 // int(itemsize))
    for mult in (256, 128, pack):
        start = target - (target % mult)
        for t in range(start, mult - 1, -mult):
            if n % t == 0:
                return t
    return n  # fall back to the full extent (always legal)


def _pick_head_block(bh, t_l, t_s, n_l_blocks):
    """Pack several (batch, head) pairs per grid step when per-head tiles are
    tiny (amortizes per-grid-step overhead, widens DMAs), but keep at least two
    'parallel' grid steps alive so dual-TensorCore chips (v7x) get work on both
    cores."""
    rows = max(t_l, t_s)
    cap = 1 if rows >= 128 else max(1, 512 // rows)
    if n_l_blocks <= 1 and bh >= 2:
        cap = min(cap, bh // 2)
    cap = max(cap, 1)
    best = 1
    for c in range(1, min(bh, cap) + 1):
        if bh % c == 0:
            best = c
    return best


def _default_exp_dtype(dtype):
    """bf16 exp hits the EUP fast path on v6e/v7x; v5e and older have no bf16
    EUP/VPU so the extra converts only add work -> keep f32 there."""
    if jnp.dtype(dtype) != jnp.bfloat16:
        return jnp.float32
    try:
        kind = jax.devices()[0].device_kind.lower()
    except Exception:
        return jnp.bfloat16
    if any(v in kind for v in ("v2", "v3", "v4", "v5")):
        return jnp.float32
    return jnp.bfloat16


# --------------------------------------------------------------------------- #
# Public wrapper
# --------------------------------------------------------------------------- #
def scaled_dot_product_attention(query, key, value, attn_mask=None,
                                 dropout_p=0.0, is_causal=False, scale=None,
                                 *, block_l=None, block_s=None,
                                 block_heads=None, exp_dtype=None,
                                 use_bf16_matmul=False, kv_buffers=None):
    """Pallas TPU implementation of ScaledDotProductAttention.forward.

    query: (B, H, L, D), key/value: (B, H, S, D) -> (B, H, L, D).

    Defaults: tL<=1024 / tS<=512 (multiples of 256/128/sublane-pack), bf16 exp
    on v6e/v7x when inputs are bf16, exact math otherwise.  `use_bf16_matmul`
    casts f32 inputs to bf16 at the kernel boundary (f32 accumulation kept).
    `kv_buffers=3` enables triple-buffering of the K/V stream (useful on v5e).
    """
    # Reference default is dropout_p=0.0 (train-mode dropout otherwise).
    assert dropout_p == 0.0, "dropout not implemented (reference default 0.0)"
    # attn_mask / is_causal are dead code in the reference module (attn_bias is
    # constructed but never added to the attention weights).  Warn instead of
    # silently dropping, but preserve the reference behaviour (ignore them).
    if attn_mask is not None or is_causal:
        warnings.warn(
            "ScaledDotProductAttention (reference) never applies attn_mask / "
            "is_causal; they are ignored here as well.", stacklevel=2)

    B, H, L, D = query.shape
    S = key.shape[-2]
    assert key.shape == (B, H, S, D) and value.shape == (B, H, S, D)

    out_dtype = query.dtype
    scale_factor = (1.0 / math.sqrt(D)) if scale is None else float(scale)

    # Optional f32 -> bf16 cast at the kernel boundary: halves the Q/K/V HBM
    # streams and uses bf16 MXU passes; accumulation stays f32 in-kernel.
    if use_bf16_matmul and jnp.dtype(query.dtype) == jnp.float32:
        query = query.astype(jnp.bfloat16)
        key = key.astype(jnp.bfloat16)
        value = value.astype(jnp.bfloat16)

    BH = B * H
    q = query.reshape(BH, L, D)
    k = key.reshape(BH, S, D)
    v = value.reshape(BH, S, D)

    itemsize = jnp.dtype(q.dtype).itemsize
    t_l = block_l if block_l is not None else _pick_seq_tile(L, 1024, itemsize)
    t_s = block_s if block_s is not None else _pick_seq_tile(S, 512, itemsize)
    n_l_blocks = L // t_l
    hb = (block_heads if block_heads is not None
          else _pick_head_block(BH, t_l, t_s, n_l_blocks))
    assert L % t_l == 0 and S % t_s == 0 and BH % hb == 0

    if exp_dtype is None:
        exp_dtype = _default_exp_dtype(v.dtype)

    grid = (BH // hb, L // t_l, S // t_s)

    kernel = functools.partial(
        _flash_sdpa_kernel,
        scale=scale_factor,
        exp_dtype=exp_dtype,
        # Exact divide for f32 outputs (matches the f32 reference tightly),
        # EUP approx reciprocal for bf16/f16 (free slot, within dtype noise).
        approx_recip=bool(jnp.dtype(out_dtype) != jnp.float32),
    )

    kv_kwargs = {}
    if kv_buffers is not None:
        kv_kwargs["pipeline_mode"] = pl.Buffered(kv_buffers)

    out = pl.pallas_call(
        kernel,
        out_shape=jax.ShapeDtypeStruct((BH, L, D), out_dtype),
        grid_spec=pltpu.PrefetchScalarGridSpec(
            num_scalar_prefetch=0,
            grid=grid,
            in_specs=[
                pl.BlockSpec((hb, t_l, D), lambda h, l, s: (h, l, 0)),
                pl.BlockSpec((hb, t_s, D), lambda h, l, s: (h, s, 0),
                             **kv_kwargs),
                pl.BlockSpec((hb, t_s, D), lambda h, l, s: (h, s, 0),
                             **kv_kwargs),
            ],
            out_specs=pl.BlockSpec((hb, t_l, D), lambda h, l, s: (h, l, 0)),
            scratch_shapes=[
                pltpu.VMEM((hb, t_l, 1), jnp.float32),   # running max
                pltpu.VMEM((hb, t_l, 1), jnp.float32),   # running sum
                pltpu.VMEM((hb, t_l, D), jnp.float32),   # output accumulator
                pltpu.VMEM((hb, t_l, D), q.dtype),       # pre-scaled Q
            ],
        ),
        compiler_params=pltpu.CompilerParams(
            dimension_semantics=("parallel", "parallel", "arbitrary"),
            # Larger default L/S tiles need more than v5e's 16 MiB scoped
            # default; 32 MiB is within every generation's physical VMEM.
            vmem_limit_bytes=32 * 1024 * 1024),
    )(q, k, v)

    return out.reshape(B, H, L, D)


# --------------------------------------------------------------------------- #
# Reference (pure JAX, f32)
# --------------------------------------------------------------------------- #
def _reference(query, key, value, scale=None):
    D = query.shape[-1]
    sf = (1.0 / math.sqrt(D)) if scale is None else scale
    qf = query.astype(jnp.float32)
    kf = key.astype(jnp.float32)
    vf = value.astype(jnp.float32)
    s = jnp.einsum("bhld,bhsd->bhls", qf, kf) * sf
    p = jax.nn.softmax(s, axis=-1)
    return jnp.einsum("bhls,bhsd->bhld", p, vf)


if __name__ == "__main__":
    root = jax.random.PRNGKey(0)

    # --- Test 1: small module-consistent shapes (single grid step, f32) ---- #
    B, H, L, S, D = 2, 2, 8, 8, 32
    kq, kk, kv = jax.random.split(root, 3)
    query = jax.random.normal(kq, (B, H, L, D), dtype=jnp.float32)
    key_t = jax.random.normal(kk, (B, H, S, D), dtype=jnp.float32)
    value = jax.random.normal(kv, (B, H, S, D), dtype=jnp.float32)

    out = jax.block_until_ready(scaled_dot_product_attention(query, key_t, value))
    ref = _reference(query, key_t, value)
    assert out.shape == (B, H, L, D)
    assert jnp.allclose(out, ref, atol=1e-5, rtol=1e-5), "f32 small-shape mismatch"

    # --- Test 2: multi-tile flash path (grid over L and S blocks, f32) ----- #
    B2, H2, L2, S2, D2 = 1, 2, 256, 384, 64
    k2q, k2k, k2v = jax.random.split(jax.random.PRNGKey(1), 3)
    q2 = jax.random.normal(k2q, (B2, H2, L2, D2), dtype=jnp.float32)
    k2 = jax.random.normal(k2k, (B2, H2, S2, D2), dtype=jnp.float32)
    v2 = jax.random.normal(k2v, (B2, H2, S2, D2), dtype=jnp.float32)

    out2 = jax.block_until_ready(
        scaled_dot_product_attention(q2, k2, v2, block_l=128, block_s=128))
    ref2 = _reference(q2, k2, v2)
    assert jnp.allclose(out2, ref2, atol=1e-4, rtol=1e-4), "f32 tiled mismatch"

    # --- Test 3: bf16 fast path (bf16 MXU, bf16 exp on v6e/v7x) ------------ #
    q3 = q2.astype(jnp.bfloat16)
    k3 = k2.astype(jnp.bfloat16)
    v3 = v2.astype(jnp.bfloat16)
    out3 = jax.block_until_ready(
        scaled_dot_product_attention(q3, k3, v3, block_l=128, block_s=128))
    ref3 = _reference(q3, k3, v3)
    assert out3.dtype == jnp.bfloat16
    assert jnp.allclose(out3.astype(jnp.float32), ref3, atol=1e-1, rtol=1e-1), \
        "bf16 tiled mismatch"

    # --- Test 4: default tile picker, long sequence, bf16 ------------------ #
    B4, H4, L4, S4, D4 = 1, 2, 1024, 1024, 64
    k4q, k4k, k4v = jax.random.split(jax.random.PRNGKey(2), 3)
    q4 = jax.random.normal(k4q, (B4, H4, L4, D4), dtype=jnp.bfloat16)
    k4 = jax.random.normal(k4k, (B4, H4, S4, D4), dtype=jnp.bfloat16)
    v4 = jax.random.normal(k4v, (B4, H4, S4, D4), dtype=jnp.bfloat16)
    out4 = jax.block_until_ready(scaled_dot_product_attention(q4, k4, v4))
    ref4 = _reference(q4, k4, v4)
    assert jnp.allclose(out4.astype(jnp.float32), ref4, atol=1e-1, rtol=1e-1), \
        "bf16 default-tile mismatch"

    # --- Test 5: f32 inputs with opt-in bf16 matmul path -------------------- #
    out5 = jax.block_until_ready(
        scaled_dot_product_attention(q2, k2, v2, use_bf16_matmul=True))
    assert out5.dtype == jnp.float32
    assert jnp.allclose(out5, ref2, atol=1e-1, rtol=1e-1), \
        "f32-with-bf16-matmul mismatch"

    print("KERNEL_OK")
</pallas_src>

<mosaic_0001>
module attributes {stable_mosaic.version = 11 : i64} {
  func.func @_flash_sdpa_kernel(%arg0: i32, %arg1: i32, %arg2: i32, %arg3: memref<2x8x32xf32, #tpu.memory_space<vmem>>, %arg4: memref<2x8x32xf32, #tpu.memory_space<vmem>>, %arg5: memref<2x8x32xf32, #tpu.memory_space<vmem>>, %arg6: memref<2x8x32xf32, #tpu.memory_space<vmem>>, %arg7: memref<2x8x1xf32, #tpu.memory_space<vmem>>, %arg8: memref<2x8x1xf32, #tpu.memory_space<vmem>>, %arg9: memref<2x8x32xf32, #tpu.memory_space<vmem>>, %arg10: memref<2x8x32xf32, #tpu.memory_space<vmem>>) attributes {dimension_semantics = [#tpu.dimension_semantics<parallel>, #tpu.dimension_semantics<parallel>, #tpu.dimension_semantics<arbitrary>], iteration_bounds = array<i64: 2, 1, 1>, scalar_prefetch = 0 : i64, scratch_operands = 4 : i64, tpu.core_type = #tpu.core_type<tc>, window_params = [{transform_indices = @transform_0, window_bounds = array<i64: 2, 8, 32>}, {transform_indices = @transform_1, window_bounds = array<i64: 2, 8, 32>}, {transform_indices = @transform_2, window_bounds = array<i64: 2, 8, 32>}, {transform_indices = @transform_3, window_bounds = array<i64: 2, 8, 32>}]} {
    %c0_i32 = arith.constant 0 : i32
    %0 = arith.cmpi eq, %arg2, %c0_i32 : i32
    %1 = arith.extui %0 : i1 to i32
    %c0_i32_0 = arith.constant 0 : i32
    %2 = arith.cmpi ne, %1, %c0_i32_0 : i32
    scf.if %2 {
      %cst_32 = arith.constant 0xFF800000 : f32
      %32 = vector.broadcast %cst_32 : f32 to vector<2x8x1xf32>
      %c0_33 = arith.constant 0 : index
      %c0_34 = arith.constant 0 : index
      %c0_35 = arith.constant 0 : index
      %33 = vector.load %arg7[%c0_33, %c0_34, %c0_35] : memref<2x8x1xf32, #tpu.memory_space<vmem>>, vector<2x8x1xf32>
      tpu.vector_store %arg7[%c0_33, %c0_34, %c0_35], %32 {strides = array<i32>} : memref<2x8x1xf32, #tpu.memory_space<vmem>>, vector<2x8x1xf32>,
      %cst_36 = arith.constant 0.000000e+00 : f32
      %34 = vector.broadcast %cst_36 : f32 to vector<2x8x1xf32>
      %c0_37 = arith.constant 0 : index
      %c0_38 = arith.constant 0 : index
      %c0_39 = arith.constant 0 : index
      %35 = vector.load %arg8[%c0_37, %c0_38, %c0_39] : memref<2x8x1xf32, #tpu.memory_space<vmem>>, vector<2x8x1xf32>
      tpu.vector_store %arg8[%c0_37, %c0_38, %c0_39], %34 {strides = array<i32>} : memref<2x8x1xf32, #tpu.memory_space<vmem>>, vector<2x8x1xf32>,
      %cst_40 = arith.constant 0.000000e+00 : f32
      %36 = vector.broadcast %cst_40 : f32 to vector<2x8x32xf32>
      %c0_41 = arith.constant 0 : index
      %c0_42 = arith.constant 0 : index
      %c0_43 = arith.constant 0 : index
      %37 = vector.load %arg9[%c0_41, %c0_42, %c0_43] : memref<2x8x32xf32, #tpu.memory_space<vmem>>, vector<2x8x32xf32>
      tpu.vector_store %arg9[%c0_41, %c0_42, %c0_43], %36 {strides = array<i32>} : memref<2x8x32xf32, #tpu.memory_space<vmem>>, vector<2x8x32xf32>,
      %c0_44 = arith.constant 0 : index
      %c0_45 = arith.constant 0 : index
      %c0_46 = arith.constant 0 : index
      %38 = vector.load %arg3[%c0_44, %c0_45, %c0_46] : memref<2x8x32xf32, #tpu.memory_space<vmem>>, vector<2x8x32xf32>
      %cst_47 = arith.constant 0.176776692 : f32
      %39 = vector.broadcast %cst_47 : f32 to vector<2x8x32xf32>
      %40 = arith.mulf %38, %39 : vector<2x8x32xf32>
      %c0_48 = arith.constant 0 : index
      %c0_49 = arith.constant 0 : index
      %c0_50 = arith.constant 0 : index
      %41 = vector.load %arg10[%c0_48, %c0_49, %c0_50] : memref<2x8x32xf32, #tpu.memory_space<vmem>>, vector<2x8x32xf32>
      tpu.vector_store %arg10[%c0_48, %c0_49, %c0_50], %40 {strides = array<i32>} : memref<2x8x32xf32, #tpu.memory_space<vmem>>, vector<2x8x32xf32>,
    } else {
    }
    %c0 = arith.constant 0 : index
    %c0_1 = arith.constant 0 : index
    %c0_2 = arith.constant 0 : index
    %3 = vector.load %arg10[%c0, %c0_1, %c0_2] : memref<2x8x32xf32, #tpu.memory_space<vmem>>, vector<2x8x32xf32>
    %c0_3 = arith.constant 0 : index
    %c0_4 = arith.constant 0 : index
    %c0_5 = arith.constant 0 : index
    %4 = vector.load %arg4[%c0_3, %c0_4, %c0_5] : memref<2x8x32xf32, #tpu.memory_space<vmem>>, vector<2x8x32xf32>
    %cst = arith.constant dense<0.000000e+00> : vector<2x8x8xf32>
    %5 = tpu.matmul %3, %4, %cst {dimension_numbers = #tpu.dot_dimension_numbers<[2], [2], [1], [1], [0, 0, 0, 1, 1, 1], [0], [0]>} : vector<2x8x32xf32>, vector<2x8x32xf32>, vector<2x8x8xf32> -> vector<2x8x8xf32>
    %c0_6 = arith.constant 0 : index
    %c0_7 = arith.constant 0 : index
    %c0_8 = arith.constant 0 : index
    %6 = vector.load %arg7[%c0_6, %c0_7, %c0_8] : memref<2x8x1xf32, #tpu.memory_space<vmem>>, vector<2x8x1xf32>
    %cst_9 = arith.constant dense<0xFF800000> : vector<2x8xf32>
    %7 = vector.multi_reduction <maximumf>, %5, %cst_9 [2] : vector<2x8x8xf32> to vector<2x8xf32>
    %8 = vector.shape_cast %7 : vector<2x8xf32> to vector<2x8x1xf32>
    %9 = arith.maximumf %6, %8 : vector<2x8x1xf32>
    %10 = arith.subf %6, %9 : vector<2x8x1xf32>
    %11 = math.exp %10 : vector<2x8x1xf32>
    %12 = vector.broadcast %9 : vector<2x8x1xf32> to vector<2x8x8xf32>
    %13 = arith.subf %5, %12 : vector<2x8x8xf32>
    %14 = math.exp %13 : vector<2x8x8xf32>
    %c0_10 = arith.constant 0 : index
    %c0_11 = arith.constant 0 : index
    %c0_12 = arith.constant 0 : index
    %15 = vector.load %arg8[%c0_10, %c0_11, %c0_12] : memref<2x8x1xf32, #tpu.memory_space<vmem>>, vector<2x8x1xf32>
    %16 = arith.mulf %11, %15 : vector<2x8x1xf32>
    %cst_13 = arith.constant dense<0.000000e+00> : vector<2x8xf32>
    %17 = vector.multi_reduction <add>, %14, %cst_13 [2] : vector<2x8x8xf32> to vector<2x8xf32>
    %18 = vector.shape_cast %17 : vector<2x8xf32> to vector<2x8x1xf32>
    %19 = arith.addf %16, %18 : vector<2x8x1xf32>
    %c0_14 = arith.constant 0 : index
    %c0_15 = arith.constant 0 : index
    %c0_16 = arith.constant 0 : index
    %20 = vector.load %arg8[%c0_14, %c0_15, %c0_16] : memref<2x8x1xf32, #tpu.memory_space<vmem>>, vector<2x8x1xf32>
    tpu.vector_store %arg8[%c0_14, %c0_15, %c0_16], %19 {strides = array<i32>} : memref<2x8x1xf32, #tpu.memory_space<vmem>>, vector<2x8x1xf32>,
    %c0_17 = arith.constant 0 : index
    %c0_18 = arith.constant 0 : index
    %c0_19 = arith.constant 0 : index
    %21 = vector.load %arg5[%c0_17, %c0_18, %c0_19] : memref<2x8x32xf32, #tpu.memory_space<vmem>>, vector<2x8x32xf32>
    %cst_20 = arith.constant dense<0.000000e+00> : vector<2x8x32xf32>
    %22 = tpu.matmul %14, %21, %cst_20 {dimension_numbers = #tpu.dot_dimension_numbers<[2], [1], [1], [2], [0, 0, 0, 1, 1, 2], [0], [0]>} : vector<2x8x8xf32>, vector<2x8x32xf32>, vector<2x8x32xf32> -> vector<2x8x32xf32>
    %c0_21 = arith.constant 0 : index
    %c0_22 = arith.constant 0 : index
    %c0_23 = arith.constant 0 : index
    %23 = vector.load %arg9[%c0_21, %c0_22, %c0_23] : memref<2x8x32xf32, #tpu.memory_space<vmem>>, vector<2x8x32xf32>
    %24 = vector.broadcast %11 : vector<2x8x1xf32> to vector<2x8x32xf32>
    %25 = arith.mulf %24, %23 : vector<2x8x32xf32>
    %26 = arith.addf %25, %22 : vector<2x8x32xf32>
    %c0_24 = arith.constant 0 : index
    %c0_25 = arith.constant 0 : index
    %c0_26 = arith.constant 0 : index
    %27 = vector.load %arg9[%c0_24, %c0_25, %c0_26] : memref<2x8x32xf32, #tpu.memory_space<vmem>>, vector<2x8x32xf32>
    tpu.vector_store %arg9[%c0_24, %c0_25, %c0_26], %26 {strides = array<i32>} : memref<2x8x32xf32, #tpu.memory_space<vmem>>, vector<2x8x32xf32>,
    %c0_27 = arith.constant 0 : index
    %c0_28 = arith.constant 0 : index
    %c0_29 = arith.constant 0 : index
    %28 = vector.load %arg7[%c0_27, %c0_28, %c0_29] : memref<2x8x1xf32, #tpu.memory_space<vmem>>, vector<2x8x1xf32>
    tpu.vector_store %arg7[%c0_27, %c0_28, %c0_29], %9 {strides = array<i32>} : memref<2x8x1xf32, #tpu.memory_space<vmem>>, vector<2x8x1xf32>,
    %c0_i32_30 = arith.constant 0 : i32
    %29 = arith.cmpi eq, %arg2, %c0_i32_30 : i32
    %30 = arith.extui %29 : i1 to i32
    %c0_i32_31 = arith.constant 0 : i32
    %31 = arith.cmpi ne, %30, %c0_i32_31 : i32
    scf.if %31 {
      %c0_32 = arith.constant 0 : index
      %c0_33 = arith.constant 0 : index
      %c0_34 = arith.constant 0 : index
      %32 = vector.load %arg8[%c0_32, %c0_33, %c0_34] : memref<2x8x1xf32, #tpu.memory_space<vmem>>, vector<2x8x1xf32>
      %33 = tpu.reciprocal %32 : vector<2x8x1xf32> -> vector<2x8x1xf32>
      %c0_35 = arith.constant 0 : index
      %c0_36 = arith.constant 0 : index
      %c0_37 = arith.constant 0 : index
      %34 = vector.load %arg9[%c0_35, %c0_36, %c0_37] : memref<2x8x32xf32, #tpu.memory_space<vmem>>, vector<2x8x32xf32>
      %35 = vector.broadcast %33 : vector<2x8x1xf32> to vector<2x8x32xf32>
      %36 = arith.mulf %34, %35 : vector<2x8x32xf32>
      %c0_38 = arith.constant 0 : index
      %c0_39 = arith.constant 0 : index
      %c0_40 = arith.constant 0 : index
      %37 = vector.load %arg6[%c0_38, %c0_39, %c0_40] : memref<2x8x32xf32, #tpu.memory_space<vmem>>, vector<2x8x32xf32>
      tpu.vector_store %arg6[%c0_38, %c0_39, %c0_40], %36 {strides = array<i32>} : memref<2x8x32xf32, #tpu.memory_space<vmem>>, vector<2x8x32xf32>,
    } else {
    }
    return
  }
  func.func @transform_0(%arg0: i32, %arg1: i32, %arg2: i32) -> (i32, i32, i32) {
    %c0_i32 = arith.constant 0 : i32
    %c0_i32_0 = arith.constant 0 : i32
    return %arg0, %arg1, %c0_i32 : i32, i32, i32
  }
  func.func @transform_1(%arg0: i32, %arg1: i32, %arg2: i32) -> (i32, i32, i32) {
    %c0_i32 = arith.constant 0 : i32
    %c0_i32_0 = arith.constant 0 : i32
    return %arg0, %arg2, %c0_i32 : i32, i32, i32
  }
  func.func @transform_2(%arg0: i32, %arg1: i32, %arg2: i32) -> (i32, i32, i32) {
    %c0_i32 = arith.constant 0 : i32
    %c0_i32_0 = arith.constant 0 : i32
    return %arg0, %arg2, %c0_i32 : i32, i32, i32
  }
  func.func @transform_3(%arg0: i32, %arg1: i32, %arg2: i32) -> (i32, i32, i32) {
    %c0_i32 = arith.constant 0 : i32
    %c0_i32_0 = arith.constant 0 : i32
    return %arg0, %arg1, %c0_i32 : i32, i32, i32
  }
}

</mosaic_0001>

<bundles_post_ra>
// kernel: tpu_custom_call.1
= control target key start
LH: loop header
LB: loop body
LE: loop exit
PB: predicated region body
PF: predicated region fallthrough
CT: control target
= control target key end

     0   :  { %s1219_s0 = inlined_call_operand.hbm [shape: f32[4,8,32], index: 0, kind: input, shape index: {}]   ;;  %s1220_s1 = inlined_call_operand.hbm [shape: f32[4,8,32], index: 1, kind: input, shape index: {}]   ;;  %s1221_s2 = inlined_call_operand.hbm [shape: f32[4,8,32], index: 2, kind: input, shape index: {}]   ;;  %s1222_s3 = inlined_call_operand.hbm [shape: f32[4,8,32], index: 3, kind: output, shape index: {}]  }
   0x1   :  { %1228 = sst [smem:[#allocation21_spill]] %s1220_s1 }
   0x2   :  { %8 = vsyncpa [#allocation7], 0 }
   0x3   :  { %10 = vsyncpa [#allocation7 + $0x1], 0 }
   0x4   :  { %11 = vsyncpa [#allocation10], 0 }
   0x5   :  { %13 = vsyncpa [#allocation10 + $0x1], 0 }
   0x6   :  { %14 = vsyncpa [#allocation8], 0 }
   0x7   :  { %16 = vsyncpa [#allocation8 + $0x1], 0  ;;  %s1030_s12 = smov 0   ;;  %s1032_s13 = smov 0  }
   0x8   :  { %s1034_s14 = smov 0   ;;  %s1036_s15 = smov 0  }
   0x9   :  { %s1038_s16 = smov 0   ;;  %s1040_s17 = smov 0  }
   0xa LB: > { %1229 = sst [smem:[#allocation16_spill]] %s989_s14  ;;  %s1061_s18 = sadd.s32 4294967295, %s1001_s17   ;;  %s1001_s17 = sphi %s1040_s17, %s22_s17   ;;  %s997_s16 = sphi %s1038_s16, %s1245_s16   ;;  %s993_s15 = sphi %s1036_s15, %s1244_s15   ;;  %s989_s14 = sphi %s1034_s14, %s1248_s14   ;;  %s985_s13 = sphi %s1032_s13, %s1247_s13   ;;  %s981_s12 = sphi %s1030_s12, %s1246_s12  }
   0xb   : > { %1230 = sst [smem:[#allocation17_spill]] %s997_s16  ;;  %s699_s19 = sadd.s32 4294967294, %s1001_s17  }
   0xc   : > { %1231 = sst [smem:[#allocation18_spill]] %s1001_s17  ;;  %s41_s20 = sadd.s32 1, %s997_s16 }
   0xd   : > { %s50_s21 = sadd.s32 1, %s989_s14  ;;  %p43_p0 = scmp.ge.s32.totalorder %s41_s20, 2 }
   0xe   : > { %p57_p1 = scmp.ne.s32.totalorder %s989_s14, %s985_s13  ;;  %p58_p2 = scmp.eq.s32.totalorder %s1001_s17, 0 }
   0xf   : > { %p63_p3 = scmp.ne.s32.totalorder %s985_s13, %s981_s12  ;;  %s1250_s20 = smov (%p43_p0, %s41_s20), 0 }
  0x10   : > { %1232 = sst [smem:[#allocation19_spill]] %s1250_s20  ;;  %p1073_p4 = por %p58_p2, %p57_p1 }
  0x11   : > { %p64_p5 = scmp.eq.s32.totalorder %s1061_s18, 0  ;;  %s45_s23 = ssub.s32 %s997_s16, %s1250_s20 }
  0x12   : > { %p145_p6 = scmp.eq.s32.totalorder %s1061_s18, 1  ;;  %p48_p7 = scmp.eq.s32.totalorder %s45_s23, 0 }
  0x13   : > { %p1081_p8 = por %p64_p5, %p63_p3  ;;  %p151_p10 = scmp.eq.s32.totalorder %s699_s19, 1 }
  0x14   : > { %p1085_p9 = por %p145_p6, %p57_p1  ;;  %p701_p12 = scmp.ge.s32.totalorder %s1001_s17, 2 }
  0x15   : > { %s1090_s26 = scalar_select %p48_p7, %s989_s14, %s50_s21  }
  0x16   : > { %p1092_p11 = por %p151_p10, %p63_p3  ;;  %p753_p13 = scmp.lt.s32.totalorder %s1001_s17, 2 }
  0x17   : > { %1236 = sst [smem:[#allocation20_spill]] %s1090_s26  ;;  %s171_s28 = sand.u32 1, %s989_s14  }
  0x18   : > { %s1099_s29 = sshll.u32 %s171_s28, 4  ;;  %s727_s30 = sshll.u32 %s997_s16, 4 }
  0x19   : > { %p1104_p0 = pnand %p753_p13, %p1073_p4  ;;  %s194_s5 = sand.u32 1, %s1001_s17  }
  0x1a   : > { %s1239_s1 = sld [smem:[#allocation21_spill]]  ;;  %s198_s10 = scalar_lea.vmem [#allocation9], %s1099_s29 }
  0x1b   : > { %s207_s11 = sshll.u32 %s198_s10, 4  ;;  %s195_s19 = scalar_lea.sflag [#allocation10], %s194_s5  ;;  %s208_s11 = int_to_ptr.vmem [resolvable:$true] %s207_s11 }
  0x1c   : > { %s1003_s21 = smov 128   ;;  %s1004_s22 = smov 8  }
  0x1d   : > { %p711_p1 = scmp.ge.s32.totalorder %s1001_s17, 1  ;;  %p238_p2 = scmp.lt.s32.totalorder %s1001_s17, 3 }
  0x1e   : > { %s172_s5 = scalar_lea.sflag [#allocation7], %s171_s28  ;;  %s227_s16 = scalar_lea.hbm %s1221_s2, %s727_s30 }
  0x1f   : > { %p1117_p3 = pnand %p711_p1, %p238_p2  ;;  %s228_s26 = sshll.u32 %s227_s16, 4  ;;  %s229_s26 = int_to_ptr.hbm [resolvable:$true] %s228_s26 }
  0x20   : > { %s204_s8 = scalar_lea.hbm %s1239_s1, %s727_s30  ;;  %s175_s1 = scalar_lea.vmem [#allocation6], %s1099_s29 }
  0x21   : > { %s205_s9 = sshll.u32 %s204_s8, 4  ;;  %s181_s8 = scalar_lea.hbm %s1219_s0, %s727_s30  ;;  %s206_s9 = int_to_ptr.hbm [resolvable:$true] %s205_s9 }
  0x22   : > { %745 = dma.hbm_to_vmem [thread:$0]  (!%p1104_p0), %s206_s9, 256, %s208_s11, %s195_s19, %s1003_s21, %s1003_s21, %s1004_s22  }
  0x23   : > { %s182_s10 = sshll.u32 %s181_s8, 4  ;;  %s184_s20 = sshll.u32 %s175_s1, 4  ;;  %s183_s10 = int_to_ptr.hbm [resolvable:$true] %s182_s10  ;;  %s185_s20 = int_to_ptr.vmem [resolvable:$true] %s184_s20 }
  0x24   : > { %742 = dma.hbm_to_vmem [thread:$0]  (!%p1104_p0), %s183_s10, 256, %s185_s20, %s172_s5, %s1003_s21, %s1003_s21, %s1004_s22  }
  0x25   : > { %s221_s14 = scalar_lea.vmem [#allocation11], %s1099_s29  ;;  %242 = sbr.rel (%p1117_p3) target bundleno = 702 (0x2be), region = 32 }
  0x26   : > { %s230_s17 = sshll.u32 %s221_s14, 4  ;;  %s1136_s1 = sand.u32 (!%p1117_p3), 1, %s985_s13   ;;  %s231_s17 = int_to_ptr.vmem [resolvable:$true] %s230_s17 }
  0x27   : > { %748 = dma.hbm_to_vmem [thread:$0]  (!%p1104_p0), %s229_s26, 256, %s231_s17, %s195_s19, %s1003_s21, %s1003_s21, %s1004_s22  }
  0x28   : > { %s1139_s20 = sshll.u32 (!%p1117_p3), %s1136_s1, 4  ;;  %s245_s28 = scalar_lea.sflag (!%p1117_p3), [#allocation7], %s1136_s1 }
  0x29   : > { %s248_s16 = scalar_lea.vmem (!%p1117_p3), [#allocation6], %s1139_s20 }
  0x2a   : > { %968 = dma.done.wait (%p1081_p8), %s245_s28, 256  }
  0x2b   : > { %970 = vsyncadd (%p1081_p8), %s245_s28, 4294967040  ;;  %s254_s14 = sand.u32 1, %s1061_s18   ;;  %s258_s26 = scalar_lea.vmem [#allocation9], %s1139_s20 }
  0x2c   : > { %s255_s17 = scalar_lea.sflag [#allocation10], %s254_s14 }
  0x2d   : > { %972 = dma.done.wait (%p1081_p8), %s255_s17, 512  }
  0x2e   : > { %974 = vsyncadd (%p1081_p8), %s255_s17, 4294966784  ;;  %vm315_vm0 = vcmask 261120   ;;  %v326_v0 = vld [vmem:[%s258_s26] sm:$0xff]  ;;  %v327_v2 = vld [vmem:[%s258_s26 + $0x8] sm:$0xff]  ;;  %vm310_vm1 = vcmask 7168   ;;  %v1005_v8 = vmov -inf  }
  0x2f   : > { %v318_v1 = vld [vmem:[%s248_s16] sm:$0xff]  ;;  %716 = vmatpush.xpose.msk.msra.mxu0 %vm315_vm0, %v326_v0  ;;  %718 = vmatpush.xpose.msk.msra.mxu1 %vm315_vm0, %v327_v2  ;;  %v319_v4 = vld [vmem:[%s248_s16 + $0x8] sm:$0xff]  ;;  %311 = vst.msk [vmem:[#allocation2] sm:$0xff] %vm310_vm1, %v1005_v8  ;;  %vm383_vm2 = vcmask 64512   ;;  %v1006_v13 = vmov 0   ;;  %v1007_v14 = vmov 0.0  }
  0x30   : > { %v320_v3 = vmul.f32 0.17677669, %v318_v1  ;;  %v321_v5 = vmul.f32 0.17677669, %v319_v4  ;;  %312 = vst.msk [vmem:[#allocation2 + $0x8] sm:$0xff] %vm310_vm1, %v1005_v8  ;;  %810 = vset.pattern.permute.xlu1 %v1006_v13  ;;  %811 = vset.pattern.permute.xlu0 %v1006_v13  ;;  %s268_s18 = scalar_lea.vmem [#allocation11], %s1139_s20 }
  0x31   : > { %812 = vset.pattern.permute.xlu2 %v1006_v13  ;;  %316 = vst.msk [vmem:[#allocation4] sm:$0xff] %vm315_vm0, %v1007_v14  ;;  %v429_v27 = vld [vmem:[%s268_s18] sm:$0xff]  ;;  %v430_v28 = vld [vmem:[%s268_s18 + $0x8] sm:$0xff]  ;;  %s301_s24 = scalar_lea.vmem [#allocation12], %s1139_s20  ;;  %s730_s29 = sshll.u32 %s993_s15, 4 }
  0x32   : > { %322 = vst.msk [vmem:[#allocation5] sm:$0xff] %vm315_vm0, %v320_v3  ;;  %449 = vmatpush.msra.mxu2 %v429_v27  ;;  %472 = vmatpush.msra.mxu3 %v430_v28  ;;  %s559_s19 = scalar_lea.hbm %s1222_s3, %s730_s29  ;;  %s560_s21 = sshll.u32 %s301_s24, 4  ;;  %s561_s21 = int_to_ptr.vmem [resolvable:$true] %s560_s21 }
  0x33   : > { %323 = vst.msk [vmem:[#allocation5 + $0x8] sm:$0xff] %vm315_vm0, %v321_v5  ;;  %s562_s22 = sshll.u32 %s559_s19, 4  ;;  %s547_s23 = scalar_lea.sflag [#allocation8], %s1136_s1  ;;  %s563_s22 = int_to_ptr.hbm [resolvable:$true] %s562_s22 }
  0x34   : > { %313 = vst.msk [vmem:[#allocation3] sm:$0xff] %vm310_vm1, %v1007_v14  ;;  %s929_s6 = sshra.s32 %s563_s22, 4  ;;  %s935_s10 = scalar_lea.hbm %s1222_s3, 32  ;;  %s930_s6 = int_to_ptr.hbm [resolvable:$true] %s929_s6 }
  0x35   : > { %314 = vst.msk [vmem:[#allocation3 + $0x8] sm:$0xff] %vm310_vm1, %v1007_v14  ;;  %s931_s7 = scalar_lea.hbm %s930_s6, 16  ;;  %p936_p7 = scmp.lt.s32.totalorder %s930_s6, %s1222_s3 }
  0x36   : > { %317 = vst.msk [vmem:[#allocation4 + $0x8] sm:$0xff] %vm315_vm0, %v1007_v14  ;;  %v381_v15 = vld [vmem:[#allocation2] sm:$0xff]  ;;  %p932_p4 = scmp.ne.s32.totalorder %s930_s6, %s931_s7  ;;  %p937_p8 = scmp.lt.s32.totalorder %s935_s10, %s931_s7 }
  0x37   : > { %v382_v20 = vld [vmem:[#allocation2 + $0x8] sm:$0xff] }
  0x38   : > { %v477_v48 = vld [vmem:[#allocation4] sm:$0xff]  ;;  %p933_p5 = pnand %p932_p4, %p1085_p9  ;;  %p938_p10 = por %p937_p8, %p936_p7 }
  0x39   : > { %v324_v6 = vld [vmem:[#allocation5] sm:$0xff] }
  0x3a   : > { %717 = vmatmul.msk.f32.vlgmr.msra.gmra.mxu0 %vm315_vm0, %v324_v6  ;;  %v325_v7 = vld [vmem:[#allocation5 + $0x8] sm:$0xff]  ;;  %p934_p6 = pneg %p933_p5 }
  0x3b   : > { %719 = vmatmul.msk.f32.vlgmr.msra.gmra.mxu1 %vm315_vm0, %v325_v7  ;;  %v414_v39 = vld [vmem:[#allocation3] sm:$0xff] }
  0x3c   : > { %v415_v43 = vld [vmem:[#allocation3 + $0x8] sm:$0xff]  ;;  %p939_p13 = pnand %p938_p10, %p934_p6 }
  0x3d   : > { %v478_v56 = vld [vmem:[#allocation4 + $0x8] sm:$0xff] }
  0xb7   : > { %v352_v9 = vpop.f32.mrf.mxu0 }
  0xb8   : > { %v384_v10 = vsel %vm383_vm2, %v352_v9, -inf  ;;  %v378_v11 = vpop.f32.mrf.mxu1 }
  0xb9   : > { %385 = vmax.xlane.f32.xlu0 %v384_v10  ;;  %v387_v12 = vsel %vm383_vm2, %v378_v11, -inf }
  0xc1   : > { %388 = vmax.xlane.f32.xlu0 %v387_v12 }
 0x12c   : > { %v386_v16 = vpop.xlane.xlu0 %385 }
 0x12d   : > { %v390_v17 = vmax.f32 %v381_v15, %v386_v16 }
 0x12f   : > { %v392_v18 = vsub.f32 %v381_v15, %v390_v17  ;;  %495 = vst.msk [vmem:[#allocation2] sm:$0xff] %vm310_vm1, %v390_v17  ;;  %400 = vperm.xlu1 %810, %v390_v17  }
 0x131   : > { %v394_v19 = vmul.f32 1.442695, %v392_v18 }
 0x133   : > { %813 = vpow2.f32 %v394_v19 }
 0x134   : > { %v389_v21 = vpop.xlane.xlu0 %388 }
 0x135   : > { %v391_v22 = vmax.f32 %v382_v20, %v389_v21 }
 0x137   : > { %v393_v23 = vsub.f32 %v382_v20, %v391_v22  ;;  %496 = vst.msk [vmem:[#allocation2 + $0x8] sm:$0xff] %vm310_vm1, %v391_v22  ;;  %405 = vperm.xlu1 %810, %v391_v22  }
 0x139   : > { %v814_v24 = vpop.eup %813  ;;  %v396_v25 = vmul.f32 1.442695, %v393_v23 }
 0x13a   : > { %481 = vperm.xlu0 %811, %v814_v24   ;;  %v416_v40 = vmul.f32 %v814_v24, %v414_v39 }
 0x13b   : > { %815 = vpow2.f32 %v396_v25 }
 0x141   : > { %v816_v26 = vpop.eup %815 }
 0x142   : > { %486 = vperm.xlu1 %810, %v816_v26   ;;  %v417_v44 = vmul.f32 %v816_v26, %v415_v43 }
 0x1a1   : > { %v401_v29 = vpop.permute.xlu1 %400 }
 0x1a2   : > { %v408_v30 = vsub.f32 %v352_v9, %v401_v29 }
 0x1a4   : > { %v410_v31 = vmul.f32 1.442695, %v408_v30 }
 0x1a6   : > { %817 = vpow2.f32 %v410_v31 }
 0x1a9   : > { %v406_v32 = vpop.permute.xlu1 %405 }
 0x1aa   : > { %v409_v33 = vsub.f32 %v378_v11, %v406_v32 }
 0x1ac   : > { %v818_v34 = vpop.eup %817  ;;  %v412_v35 = vmul.f32 1.442695, %v409_v33  ;;  %v482_v49 = vpop.permute.xlu0 %481 }
 0x1ad   : > { %720 = vmatmul.msk.f32.vlgmr.msra.gmra.mxu2 %vm383_vm2, %v818_v34  ;;  %v418_v36 = vsel %vm383_vm2, %v818_v34, 0.0  ;;  %v489_v50 = vmul.f32 %v482_v49, %v477_v48 }
 0x1ae   : > { %819 = vpow2.f32 %v412_v35  ;;  %419 = vadd.xlane.f32.xlu2 %v418_v36 }
 0x1b4   : > { %v820_v37 = vpop.eup %819  ;;  %v487_v57 = vpop.permute.xlu1 %486 }
 0x1b5   : > { %721 = vmatmul.msk.f32.vlgmr.msra.gmra.mxu3 %vm383_vm2, %v820_v37  ;;  %v421_v38 = vsel %vm383_vm2, %v820_v37, 0.0  ;;  %v490_v60 = vmul.f32 %v487_v57, %v478_v56 }
 0x1b6   : > { %422 = vadd.xlane.f32.xlu2 %v421_v38 }
 0x221   : > { %v420_v41 = vpop.xlane.xlu2 %419 }
 0x222   : > { %v424_v42 = vadd.f32 %v420_v41, %v416_v40 }
 0x224   : > { %427 = vst.msk [vmem:[#allocation3] sm:$0xff] %vm310_vm1, %v424_v42 }
 0x229   : > { %v423_v45 = vpop.xlane.xlu2 %422 }
 0x22a   : > { %v425_v46 = vadd.f32 %v423_v45, %v417_v44 }
 0x22b   : > { %v500_v47 = vld [vmem:[#allocation3] sm:$0xff] }
 0x22c   : > { %428 = vst.msk [vmem:[#allocation3 + $0x8] sm:$0xff] %vm310_vm1, %v425_v46  ;;  %821 = vrcp.f32 %v500_v47  ;;  %v513_v59 = vand.u32 2147483648, %v500_v47  ;;  %v511_v62 = vand.u32 2147483647, %v500_v47  ;;  %vm507_vm4 = vweird.f32 %v500_v47 }
 0x22e   : > { %v514_v3 = vor.u32 1.1754944e-38, %v513_v59  ;;  %vm512_vm6 = vcmp.eq.f32.partialorder %v511_v62, 8.507059e+37 }
 0x230   : > { %v451_v51 = vpop.f32.mrf.mxu2 }
 0x231   : > { %v491_v52 = vadd.f32 %v489_v50, %v451_v51 }
 0x232   : > { %v822_v53 = vpop.eup %821 }
 0x233   : > { %493 = vst.msk [vmem:[#allocation4] sm:$0xff] %vm315_vm0, %v491_v52  ;;  %v503_v54 = vmul.f32 %v822_v53, %v500_v47  ;;  %v501_v55 = vld [vmem:[#allocation3 + $0x8] sm:$0xff]  ;;  %vm508_vm3 = vweird.f32 %v822_v53 }
 0x234   : > { %823 = vrcp.f32 %v501_v55  ;;  %vm509_vm5 = vmor %vm507_vm4, %vm508_vm3  ;;  %v527_v8 = vand.u32 2147483648, %v501_v55  ;;  %v525_v10 = vand.u32 2147483647, %v501_v55  ;;  %vm521_vm8 = vweird.f32 %v501_v55 }
 0x235   : > { %v504_v58 = vsub.f32 1.0, %v503_v54 }
 0x236   : > { %v528_v12 = vor.u32 1.1754944e-38, %v527_v8  ;;  %vm526_vm10 = vcmp.eq.f32.partialorder %v525_v10, 8.507059e+37 }
 0x237   : > { %v505_v61 = vmul.f32 %v822_v53, %v504_v58 }
 0x238   : > { %v474_v63 = vpop.f32.mrf.mxu3 }
 0x239   : > { %v492_v0 = vadd.f32 %v490_v60, %v474_v63  ;;  %v506_v1 = vadd.f32 %v822_v53, %v505_v61 }
 0x23a   : > { %v824_v2 = vpop.eup %823  ;;  %v530_v15 = vld [vmem:[#allocation4] sm:$0xff] }
 0x23b   : > { %494 = vst.msk [vmem:[#allocation4 + $0x8] sm:$0xff] %vm315_vm0, %v492_v0  ;;  %v510_v4 = vsel %vm509_vm5, %v822_v53, %v506_v1  ;;  %v517_v5 = vmul.f32 %v824_v2, %v501_v55  ;;  %vm522_vm7 = vweird.f32 %v824_v2 }
 0x23c   : > { %v515_v6 = vsel %vm512_vm6, %v514_v3, %v510_v4  ;;  %vm523_vm9 = vmor %vm521_vm8, %vm522_vm7 }
 0x23d   : > { %534 = vperm.xlu2 %812, %v515_v6   ;;  %v518_v7 = vsub.f32 1.0, %v517_v5 }
 0x23f   : > { %v519_v9 = vmul.f32 %v824_v2, %v518_v7 }
 0x241   : > { %v520_v11 = vadd.f32 %v824_v2, %v519_v9 }
 0x242   : > { %v531_v18 = vld [vmem:[#allocation4 + $0x8] sm:$0xff] }
 0x243   : > { %v524_v13 = vsel %vm523_vm9, %v824_v2, %v520_v11 }
 0x244   : > { %v529_v14 = vsel %vm526_vm10, %v528_v12, %v524_v13 }
 0x245   : > { %539 = vperm.xlu1 %810, %v529_v14  }
 0x297   : > { %v535_v16 = vpop.permute.xlu2 %534 }
 0x298   : > { %v542_v17 = vmul.f32 %v535_v16, %v530_v15 }
 0x29a   : > { %544 = vst.msk [vmem:[%s301_s24] sm:$0xff] %vm315_vm0, %v542_v17 }
 0x2b7   : > { %v540_v19 = vpop.permute.xlu1 %539 }
 0x2b8   : > { %v543_v20 = vmul.f32 %v540_v19, %v531_v18 }
 0x2ba   : > { %545 = vst.msk [vmem:[%s301_s24 + $0x8] sm:$0xff] %vm315_vm0, %v543_v20 }
 0x2bb   : > { %942 = shalt.err (!%p939_p13)
}
 0x2bc   : > { %s1008_s11 = smov 128   ;;  %s1009_s1 = smov 8  }
 0x2bd   : > { %737 = dma.vmem_to_hbm [thread:$0]  (%p1085_p9), %s561_s21, 256, %s563_s22, %s547_s23, %s1008_s11, %s1008_s11, %s1009_s1  }
 0x2be PF: > { %s1241_s20 = sld [smem:[#allocation18_spill]]  ;;  %s577_s28 = sand.u32 1, %s981_s12  }
 0x2bf   : > { %p750_p0 = pnand %p701_p12, %p1092_p11  ;;  %s578_s16 = scalar_lea.sflag [#allocation8], %s577_s28 }
 0x2c1   : > { %p751_p1 = pneg %p750_p0 }
 0x2c3   : > { %976 = dma.done.wait (%p751_p1), %s578_s16, 256  }
 0x2c4   : > { %978 = vsyncadd (%p751_p1), %s578_s16, 4294967040  ;;  %s22_s17 = sadd.s32 1, %s1241_s20   ;;  %s1242_s14 = sld [smem:[#allocation16_spill]] }
 0x2c5   : > { %p19_p2 = scmp.ge.s32.totalorder %s22_s17, 4   ;;  %s1243_s26 = sld [smem:[#allocation20_spill]] }
 0x2c6   : > { %s1244_s15 = sld [smem:[#allocation17_spill]]  ;;  %s1246_s12 = smov %s985_s13 }
 0x2c7   : > { %s1245_s16 = sld [smem:[#allocation19_spill]]  ;;  %21 = sbr.rel (!%p19_p2) target bundleno = 10 (0xa), region = 109 }
 0x2ca   : > { %s1247_s13 = smov %s1242_s14 }
 0x2cb   : > { %s1248_s14 = smov %s1243_s26 }
 0x2cc   :  { %584 = vsyncpa [#allocation7], 1 }
 0x2cd   :  { %586 = vsyncpa [#allocation7 + $0x1], 1 }
 0x2ce   :  { %587 = vsyncpa [#allocation10], 1 }
 0x2cf   :  { %589 = vsyncpa [#allocation10 + $0x1], 1 }
 0x2d0   :  { %590 = vsyncpa [#allocation8], 1 }
 0x2d1   :  { %592 = vsyncpa [#allocation8 + $0x1], 1 }

</bundles_post_ra>
